<compile_context>
chip_gen: v6e
topology: v6e:2x2x1
jax: 0.10.0
libtpu: 0.0.40
codegen_flags: <defaults>
</compile_context>

<pallas_src>
import jax
import jax.numpy as jnp
from jax.experimental import pallas as pl
from jax.experimental.pallas import tpu as pltpu


def _round_up(n, m):
    return ((n + m - 1) // m) * m


def _vae_cls_kernel(x_ref, w_in_ref, b_in_ref,
                    w_head_ref, b_head_ref,
                    w_dec_ref, b_dec_ref,
                    eps_ref, out_ref):
    lat_p = eps_ref.shape[-1]

    # Encoder input layer + ReLU (bf16 MXU operands, f32 accumulate + epilogue).
    h = jnp.dot(x_ref[...], w_in_ref[...],
                preferred_element_type=jnp.float32) + b_in_ref[...]
    h = jnp.maximum(h, 0.0)

    # Fused mu|log_sigma head: one MXU push, then slice (lane-aligned at 128).
    head = jnp.dot(h.astype(w_head_ref.dtype), w_head_ref[...],
                   preferred_element_type=jnp.float32) + b_head_ref[...]
    mu = head[:, :lat_p]
    sigma = jnp.exp(head[:, lat_p:])

    # torch.nan_to_num(sigma, nan=0.01, neginf=0.01): exp never returns -inf,
    # but +inf (overflow) maps to float32 max by torch's default posinf.
    sigma = jnp.where(jnp.isnan(sigma), jnp.float32(0.01), sigma)
    sigma = jnp.where(jnp.isposinf(sigma),
                      jnp.float32(jnp.finfo(jnp.float32).max), sigma)

    # Reparameterization: z = mu + sigma * eps   (eps ~ N(0,1), padded lanes = 0)
    z = mu + sigma * eps_ref[...]

    # Decoder (classification head); padded K rows of w_dec are zero.
    out_ref[...] = (jnp.dot(z.astype(w_dec_ref.dtype), w_dec_ref[...],
                            preferred_element_type=jnp.float32) + b_dec_ref[...])


def vae_for_classification(x, params, eps, *, tb=128):
    """x: (B, input_size) f32; eps: (B, n_latent) f32 standard-normal sample."""
    B, input_size = x.shape
    hidden = params["w_in"].shape[1]
    n_latent = params["w_mu"].shape[1]
    n_out = params["w_dec"].shape[1]

    lat_p = _round_up(n_latent, 128)
    out_p = _round_up(n_out, 128)
    b_pad = _round_up(B, tb)

    # Pad batch (rows) if needed.
    if b_pad != B:
        x = jnp.pad(x, ((0, b_pad - B), (0, 0)))
        eps = jnp.pad(eps, ((0, b_pad - B), (0, 0)))
    eps_p = jnp.pad(eps, ((0, 0), (0, lat_p - n_latent)))  # zero-padded lanes

    # Fuse mu|sigma heads and zero-pad the tiny lane dims up to 128.
    w_mu_p = jnp.pad(params["w_mu"], ((0, 0), (0, lat_p - n_latent)))
    w_sg_p = jnp.pad(params["w_sg"], ((0, 0), (0, lat_p - n_latent)))
    w_head = jnp.concatenate([w_mu_p, w_sg_p], axis=1)          # (hidden, 2*lat_p)
    b_mu_p = jnp.pad(params["b_mu"], ((0, 0), (0, lat_p - n_latent)))
    b_sg_p = jnp.pad(params["b_sg"], ((0, 0), (0, lat_p - n_latent)))
    b_head = jnp.concatenate([b_mu_p, b_sg_p], axis=1)          # (1, 2*lat_p)

    w_dec_p = jnp.pad(params["w_dec"], ((0, lat_p - n_latent), (0, out_p - n_out)))
    b_dec_p = jnp.pad(params["b_dec"], ((0, 0), (0, out_p - n_out)))

    # bf16 for MXU operands; biases / epilogue stay f32.
    bf = jnp.bfloat16
    x_bf = x.astype(bf)
    w_in_bf = params["w_in"].astype(bf)
    w_head_bf = w_head.astype(bf)
    w_dec_bf = w_dec_p.astype(bf)

    args = (x_bf, w_in_bf, params["b_in"],
            w_head_bf, b_head, w_dec_bf, b_dec_p, eps_p)

    in_specs = [
        pl.BlockSpec((tb, input_size), lambda i: (i, 0)),        # x
        pl.BlockSpec((input_size, hidden), lambda i: (0, 0)),    # w_in (resident)
        pl.BlockSpec((1, hidden), lambda i: (0, 0)),             # b_in
        pl.BlockSpec((hidden, 2 * lat_p), lambda i: (0, 0)),     # w_head (resident)
        pl.BlockSpec((1, 2 * lat_p), lambda i: (0, 0)),          # b_head
        pl.BlockSpec((lat_p, out_p), lambda i: (0, 0)),          # w_dec (resident)
        pl.BlockSpec((1, out_p), lambda i: (0, 0)),              # b_dec
        pl.BlockSpec((tb, lat_p), lambda i: (i, 0)),             # eps
    ]
    out_specs = pl.BlockSpec((tb, out_p), lambda i: (i, 0))

    cost = pl.CostEstimate(
        flops=2 * b_pad * (input_size * hidden + hidden * 2 * lat_p + lat_p * out_p),
        transcendentals=b_pad * lat_p,
        bytes_accessed=sum(int(a.size) * a.dtype.itemsize for a in args)
                       + b_pad * out_p * 4,
    )

    out = pl.pallas_call(
        _vae_cls_kernel,
        out_shape=jax.ShapeDtypeStruct((b_pad, out_p), jnp.float32),
        grid_spec=pltpu.PrefetchScalarGridSpec(
            num_scalar_prefetch=0,
            grid=(b_pad // tb,),
            in_specs=in_specs,
            out_specs=out_specs,
        ),
        compiler_params=pltpu.CompilerParams(
            dimension_semantics=("parallel",)),
        cost_estimate=cost,
    )(*args)

    return out[:B, :n_out]


def init_params(key, input_size, intermediate_size, n_latent, n_out):
    ks = jax.random.split(key, 8)

    def lin(kw, kb, fan_in, fan_out):
        bound = 1.0 / jnp.sqrt(jnp.float32(fan_in))
        w = jax.random.uniform(kw, (fan_in, fan_out), jnp.float32, -bound, bound)
        b = jax.random.uniform(kb, (1, fan_out), jnp.float32, -bound, bound)
        return w, b

    w_in, b_in = lin(ks[0], ks[1], input_size, intermediate_size)
    w_mu, b_mu = lin(ks[2], ks[3], intermediate_size, n_latent)
    w_sg, b_sg = lin(ks[4], ks[5], intermediate_size, n_latent)
    w_dec, b_dec = lin(ks[6], ks[7], n_latent, n_out)
    return dict(w_in=w_in, b_in=b_in, w_mu=w_mu, b_mu=b_mu,
                w_sg=w_sg, b_sg=b_sg, w_dec=w_dec, b_dec=b_dec)


def _reference(x, p, eps):
    """Same math path as the kernel (bf16 MXU operands, f32 accumulation)."""
    bf = jnp.bfloat16
    h = jnp.dot(x.astype(bf), p["w_in"].astype(bf),
                preferred_element_type=jnp.float32) + p["b_in"]
    h = jnp.maximum(h, 0.0)
    mu = jnp.dot(h.astype(bf), p["w_mu"].astype(bf),
                 preferred_element_type=jnp.float32) + p["b_mu"]
    lg = jnp.dot(h.astype(bf), p["w_sg"].astype(bf),
                 preferred_element_type=jnp.float32) + p["b_sg"]
    sigma = jnp.exp(lg)
    sigma = jnp.where(jnp.isnan(sigma), jnp.float32(0.01), sigma)
    sigma = jnp.where(jnp.isposinf(sigma),
                      jnp.float32(jnp.finfo(jnp.float32).max), sigma)
    z = mu + sigma * eps
    return jnp.dot(z.astype(bf), p["w_dec"].astype(bf),
                   preferred_element_type=jnp.float32) + p["b_dec"]


if __name__ == "__main__":
    # Small shapes consistent with the module (flat-feature MLP); batch sized to
    # exercise the batch grid (2 programs of 128 rows).
    B, INPUT, HIDDEN, LATENT, OUT = 256, 256, 128, 8, 16

    key = jax.random.PRNGKey(0)
    k_x, k_eps, k_p = jax.random.split(key, 3)

    x = jax.random.normal(k_x, (B, INPUT), jnp.float32)
    eps = jax.random.normal(k_eps, (B, LATENT), jnp.float32)  # gaussian.sample
    params = init_params(k_p, INPUT, HIDDEN, LATENT, OUT)

    out = vae_for_classification(x, params, eps)
    out = jax.block_until_ready(out)

    ref = _reference(x, params, eps)
    assert out.shape == (B, OUT)
    assert jnp.allclose(out, ref, atol=1e-3, rtol=1e-3), "mismatch vs reference"

    # NOTE: encoder.kl is computed in PyTorch but unused by the forward return
    # value of VAEForClassification, so it is omitted here.
    print("KERNEL_OK")
</pallas_src>

<mosaic_0001>
module attributes {stable_mosaic.version = 11 : i64} {
  func.func @_vae_cls_kernel(%arg0: i32, %arg1: memref<128x256xbf16, #tpu.memory_space<vmem>>, %arg2: memref<256x128xbf16, #tpu.memory_space<vmem>>, %arg3: memref<1x128xf32, #tpu.memory_space<vmem>>, %arg4: memref<128x256xbf16, #tpu.memory_space<vmem>>, %arg5: memref<1x256xf32, #tpu.memory_space<vmem>>, %arg6: memref<128x128xbf16, #tpu.memory_space<vmem>>, %arg7: memref<1x128xf32, #tpu.memory_space<vmem>>, %arg8: memref<128x128xf32, #tpu.memory_space<vmem>>, %arg9: memref<128x128xf32, #tpu.memory_space<vmem>>) attributes {dimension_semantics = [#tpu.dimension_semantics<parallel>], iteration_bounds = array<i64: 2>, scalar_prefetch = 0 : i64, scratch_operands = 0 : i64, tpu.core_type = #tpu.core_type<tc>, window_params = [{transform_indices = @transform_0, window_bounds = array<i64: 128, 256>}, {pipeline_mode = #tpu.pipeline_mode<synchronous>, transform_indices = @transform_1, window_bounds = array<i64: 256, 128>}, {pipeline_mode = #tpu.pipeline_mode<synchronous>, transform_indices = @transform_2, window_bounds = array<i64: 1, 128>}, {pipeline_mode = #tpu.pipeline_mode<synchronous>, transform_indices = @transform_3, window_bounds = array<i64: 128, 256>}, {pipeline_mode = #tpu.pipeline_mode<synchronous>, transform_indices = @transform_4, window_bounds = array<i64: 1, 256>}, {pipeline_mode = #tpu.pipeline_mode<synchronous>, transform_indices = @transform_5, window_bounds = array<i64: 128, 128>}, {pipeline_mode = #tpu.pipeline_mode<synchronous>, transform_indices = @transform_6, window_bounds = array<i64: 1, 128>}, {transform_indices = @transform_7, window_bounds = array<i64: 128, 128>}, {transform_indices = @transform_8, window_bounds = array<i64: 128, 128>}]} {
    %c0 = arith.constant 0 : index
    %c0_0 = arith.constant 0 : index
    %0 = vector.load %arg1[%c0, %c0_0] : memref<128x256xbf16, #tpu.memory_space<vmem>>, vector<128x256xbf16>
    %c0_1 = arith.constant 0 : index
    %c0_2 = arith.constant 0 : index
    %1 = vector.load %arg2[%c0_1, %c0_2] : memref<256x128xbf16, #tpu.memory_space<vmem>>, vector<256x128xbf16>
    %cst = arith.constant dense<0.000000e+00> : vector<128x128xf32>
    %2 = tpu.matmul %0, %1, %cst {dimension_numbers = #tpu.dot_dimension_numbers<[1], [0], [0], [1], [0, 0, 1, 1], [], []>} : vector<128x256xbf16>, vector<256x128xbf16>, vector<128x128xf32> -> vector<128x128xf32>
    %c0_3 = arith.constant 0 : index
    %c0_4 = arith.constant 0 : index
    %3 = vector.load %arg3[%c0_3, %c0_4] : memref<1x128xf32, #tpu.memory_space<vmem>>, vector<1x128xf32>
    %4 = vector.broadcast %3 : vector<1x128xf32> to vector<128x128xf32>
    %5 = arith.addf %2, %4 : vector<128x128xf32>
    %cst_5 = arith.constant 0.000000e+00 : f32
    %6 = vector.broadcast %cst_5 : f32 to vector<128x128xf32>
    %7 = arith.maximumf %5, %6 : vector<128x128xf32>
    %8 = arith.truncf %7 : vector<128x128xf32> to vector<128x128xbf16>
    %c0_6 = arith.constant 0 : index
    %c0_7 = arith.constant 0 : index
    %9 = vector.load %arg4[%c0_6, %c0_7] : memref<128x256xbf16, #tpu.memory_space<vmem>>, vector<128x256xbf16>
    %cst_8 = arith.constant dense<0.000000e+00> : vector<128x256xf32>
    %10 = tpu.matmul %8, %9, %cst_8 {dimension_numbers = #tpu.dot_dimension_numbers<[1], [0], [0], [1], [0, 0, 1, 1], [], []>} : vector<128x128xbf16>, vector<128x256xbf16>, vector<128x256xf32> -> vector<128x256xf32>
    %c0_9 = arith.constant 0 : index
    %c0_10 = arith.constant 0 : index
    %11 = vector.load %arg5[%c0_9, %c0_10] : memref<1x256xf32, #tpu.memory_space<vmem>>, vector<1x256xf32>
    %12 = vector.broadcast %11 : vector<1x256xf32> to vector<128x256xf32>
    %13 = arith.addf %10, %12 : vector<128x256xf32>
    %14 = vector.extract_strided_slice %13 {offsets = [0, 0], sizes = [128, 128], strides = [1, 1]} : vector<128x256xf32> to vector<128x128xf32>
    %15 = vector.extract_strided_slice %13 {offsets = [0, 128], sizes = [128, 128], strides = [1, 1]} : vector<128x256xf32> to vector<128x128xf32>
    %16 = math.exp %15 : vector<128x128xf32>
    %17 = arith.cmpf one, %16, %16 : vector<128x128xf32>
    %cst_11 = arith.constant 0.00999999977 : f32
    %18 = vector.broadcast %cst_11 : f32 to vector<128x128xf32>
    %19 = arith.select %17, %18, %16 : vector<128x128xi1>, vector<128x128xf32>
    %cst_12 = arith.constant 0x7F800000 : f32
    %20 = vector.broadcast %cst_12 : f32 to vector<128x128xf32>
    %21 = arith.cmpf oeq, %19, %20 : vector<128x128xf32>
    %cst_13 = arith.constant 3.40282347E+38 : f32
    %22 = vector.broadcast %cst_13 : f32 to vector<128x128xf32>
    %23 = arith.select %21, %22, %19 : vector<128x128xi1>, vector<128x128xf32>
    %c0_14 = arith.constant 0 : index
    %c0_15 = arith.constant 0 : index
    %24 = vector.load %arg8[%c0_14, %c0_15] : memref<128x128xf32, #tpu.memory_space<vmem>>, vector<128x128xf32>
    %25 = arith.mulf %23, %24 : vector<128x128xf32>
    %26 = arith.addf %14, %25 : vector<128x128xf32>
    %27 = arith.truncf %26 : vector<128x128xf32> to vector<128x128xbf16>
    %c0_16 = arith.constant 0 : index
    %c0_17 = arith.constant 0 : index
    %28 = vector.load %arg6[%c0_16, %c0_17] : memref<128x128xbf16, #tpu.memory_space<vmem>>, vector<128x128xbf16>
    %cst_18 = arith.constant dense<0.000000e+00> : vector<128x128xf32>
    %29 = tpu.matmul %27, %28, %cst_18 {dimension_numbers = #tpu.dot_dimension_numbers<[1], [0], [0], [1], [0, 0, 1, 1], [], []>} : vector<128x128xbf16>, vector<128x128xbf16>, vector<128x128xf32> -> vector<128x128xf32>
    %c0_19 = arith.constant 0 : index
    %c0_20 = arith.constant 0 : index
    %30 = vector.load %arg7[%c0_19, %c0_20] : memref<1x128xf32, #tpu.memory_space<vmem>>, vector<1x128xf32>
    %31 = vector.broadcast %30 : vector<1x128xf32> to vector<128x128xf32>
    %32 = arith.addf %29, %31 : vector<128x128xf32>
    %c0_21 = arith.constant 0 : index
    %c0_22 = arith.constant 0 : index
    %33 = vector.load %arg9[%c0_21, %c0_22] : memref<128x128xf32, #tpu.memory_space<vmem>>, vector<128x128xf32>
    tpu.vector_store %arg9[%c0_21, %c0_22], %32 {strides = array<i32>} : memref<128x128xf32, #tpu.memory_space<vmem>>, vector<128x128xf32>,
    return
  }
  func.func @transform_0(%arg0: i32) -> (i32, i32) {
    %c0_i32 = arith.constant 0 : i32
    %c0_i32_0 = arith.constant 0 : i32
    return %arg0, %c0_i32 : i32, i32
  }
  func.func @transform_1(%arg0: i32) -> (i32, i32) {
    %c0_i32 = arith.constant 0 : i32
    %c0_i32_0 = arith.constant 0 : i32
    %c0_i32_1 = arith.constant 0 : i32
    return %c0_i32, %c0_i32_0 : i32, i32
  }
  func.func @transform_2(%arg0: i32) -> (i32, i32) {
    %c0_i32 = arith.constant 0 : i32
    %c0_i32_0 = arith.constant 0 : i32
    %c0_i32_1 = arith.constant 0 : i32
    return %c0_i32, %c0_i32_0 : i32, i32
  }
  func.func @transform_3(%arg0: i32) -> (i32, i32) {
    %c0_i32 = arith.constant 0 : i32
    %c0_i32_0 = arith.constant 0 : i32
    %c0_i32_1 = arith.constant 0 : i32
    return %c0_i32, %c0_i32_0 : i32, i32
  }
  func.func @transform_4(%arg0: i32) -> (i32, i32) {
    %c0_i32 = arith.constant 0 : i32
    %c0_i32_0 = arith.constant 0 : i32
    %c0_i32_1 = arith.constant 0 : i32
    return %c0_i32, %c0_i32_0 : i32, i32
  }
  func.func @transform_5(%arg0: i32) -> (i32, i32) {
    %c0_i32 = arith.constant 0 : i32
    %c0_i32_0 = arith.constant 0 : i32
    %c0_i32_1 = arith.constant 0 : i32
    return %c0_i32, %c0_i32_0 : i32, i32
  }
  func.func @transform_6(%arg0: i32) -> (i32, i32) {
    %c0_i32 = arith.constant 0 : i32
    %c0_i32_0 = arith.constant 0 : i32
    %c0_i32_1 = arith.constant 0 : i32
    return %c0_i32, %c0_i32_0 : i32, i32
  }
  func.func @transform_7(%arg0: i32) -> (i32, i32) {
    %c0_i32 = arith.constant 0 : i32
    %c0_i32_0 = arith.constant 0 : i32
    return %arg0, %c0_i32 : i32, i32
  }
  func.func @transform_8(%arg0: i32) -> (i32, i32) {
    %c0_i32 = arith.constant 0 : i32
    %c0_i32_0 = arith.constant 0 : i32
    return %arg0, %c0_i32 : i32, i32
  }
}

</mosaic_0001>

<bundles_post_ra>
// kernel: tpu_custom_call.1
= control target key start
LH: loop header
LB: loop body
LE: loop exit
PB: predicated region body
PF: predicated region fallthrough
CT: control target
= control target key end

     0   :  { %s2566_s0 = inlined_call_operand.hbm [shape: bf16[256,256], index: 0, kind: input, shape index: {}]   ;;  %s2567_s1 = inlined_call_operand.hbm [shape: bf16[256,128], index: 1, kind: input, shape index: {}]   ;;  %s2568_s2 = inlined_call_operand.vmem [shape: f32[1,128], index: 2, kind: input, shape index: {}]   ;;  %s2569_s3 = inlined_call_operand.hbm [shape: bf16[128,256], index: 3, kind: input, shape index: {}]   ;;  %s2570_s4 = inlined_call_operand.vmem [shape: f32[1,256], index: 4, kind: input, shape index: {}]   ;;  %s2571_s5 = inlined_call_operand.hbm [shape: bf16[128,128], index: 5, kind: input, shape index: {}]   ;;  %s2572_s6 = inlined_call_operand.vmem [shape: f32[1,128], index: 6, kind: input, shape index: {}]   ;;  %s2573_s7 = inlined_call_operand.hbm [shape: f32[256,128], index: 7, kind: input, shape index: {}]   ;;  %s2574_s8 = inlined_call_operand.hbm [shape: f32[256,128], index: 8, kind: output, shape index: {}]  }
   0x1   :  { %2587 = sst [smem:[#allocation21_spill]] %s2567_s1 }
   0x2   :  { %13 = vsyncpa [#allocation3], 0 }
   0x3   :  { %15 = vsyncpa [#allocation3 + $0x1], 0 }
   0x4   :  { %16 = vsyncpa [#allocation6], 0 }
   0x5   :  { %17 = vsyncpa [#allocation9], 0 }
   0x6   :  { %18 = vsyncpa [#allocation4], 0 }
   0x7   :  { %20 = vsyncpa [#allocation4 + $0x1], 0  ;;  %s2133_s27 = smov 0   ;;  %s2135_s28 = smov 0  }
   0x8   :  { %s2137_s29 = smov 0   ;;  %s2139_s30 = smov 0  }
   0x9 LB: > { %2588 = sst [smem:[#allocation17_spill]] %s2061_s27  ;;  %s2154_s9 = sadd.s32 4294967295, %s2073_s30   ;;  %s2073_s30 = sphi %s2139_s30, %s2615_s30   ;;  %s2069_s29 = sphi %s2137_s29, %s2619_s29   ;;  %s2065_s28 = sphi %s2135_s28, %s2618_s28   ;;  %s2061_s27 = sphi %s2133_s27, %s2617_s27  }
   0xa   : > { %s1455_s10 = sadd.s32 4294967294, %s2073_s30   ;;  %p46_p0 = scmp.ne.s32.totalorder %s2065_s28, %s2061_s27 }
   0xb   : > { %p2581_p1 = scmp.eq.s32.totalorder %s2154_s9, 0  ;;  %p222_p2 = scmp.eq.s32.totalorder %s2154_s9, 1 }
   0xc   : > { %p228_p3 = scmp.eq.s32.totalorder %s1455_s10, 1  ;;  %p1456_p5 = scmp.ge.s32.totalorder %s2073_s30, 1 }
   0xd   : > { %p2163_p4 = por %p2581_p1, %p46_p0  ;;  %p235_p7 = scmp.lt.s32.totalorder %s2073_s30, 3 }
   0xe   : > { %p2168_p6 = por %p228_p3, %p46_p0  ;;  %s2075_s14 = smov [#allocation5]  }
   0xf   : > { %s2589_s11 = scalar_select %p2163_p4, 1, 0 }
  0x10   : > { %s2590_s12 = scalar_select %p2168_p6, 1, 0 }
  0x11   : > { %p2173_p8 = pnand %p1456_p5, %p235_p7  ;;  %s247_s15 = sshll.u32 %s2075_s14, 4  ;;  %s248_s15 = int_to_ptr.vmem [resolvable:$true] %s247_s15 }
  0x12   : > { %2591 = sst [smem:[#allocation18_spill]] %s2590_s12  ;;  %s2187_s17 = sadd.s32 1, %s2073_s30  }
  0x13   : > { %s2592_s13 = scalar_select %p2173_p8, 1, 0 }
  0x14   : > { %p1688_p9 = pneg %p2173_p8  ;;  %2594 = sst [smem:[#allocation19_spill]] %s2187_s17 }
  0x15   : > { %s33_s18 = sadd.s32 1, %s2069_s29  ;;  %s30_s19 = ssub.s32 %s2073_s30, %s2187_s17 }
  0x16   : > { %p2182_p11 = pnand %p1688_p9, %p2581_p1  ;;  %s1874_s20 = scalar_lea.vmem %s248_s15, 2048 }
  0x17   : > { %p1875_p13 = scmp.ne.s32.totalorder %s248_s15, %s1874_s20  ;;  %p1882_p5 = scmp.lt.s32.totalorder %s248_s15, %s248_s15 }
  0x18   : > { %p2582_p12 = pneg %p2182_p11  ;;  %p1883_p7 = scmp.lt.s32.totalorder %s1874_s20, %s1874_s20 }
  0x1a   : > { %p1877_p0 = pnand %p1875_p13, %p2582_p12  ;;  %p1884_p9 = por %p1883_p7, %p1882_p5 }
  0x1c   : > { %p1878_p3 = pneg %p1877_p0 }
  0x1e   : > { %p1885_p10 = pnand %p1884_p9, %p1878_p3 }
  0x20   : > { %1888 = shalt.err (!%p1885_p10)
}
  0x21   : > { %s2579_s21 = smov 64   ;;  %s2580_s22 = smov 4  }
  0x22   : > { %s2595_s1 = sld [smem:[#allocation21_spill]]  ;;  %p31_p10 = scmp.eq.s32.totalorder %s30_s19, 0 }
  0x23   : > { %p40_p13 = scmp.ne.s32.totalorder %s2069_s29, %s2065_s28  ;;  %p41_p0 = scmp.eq.s32.totalorder %s2073_s30, 0 }
  0x24   : > { %s2209_s25 = scalar_select %p31_p10, %s2069_s29, %s33_s18  }
  0x25   : > { %p42_p3 = por %p41_p0, %p40_p13  ;;  %p2213_p5 = por %p222_p2, %p40_p13 }
  0x26   : > { %2596 = sst [smem:[#allocation20_spill]] %s2209_s25  ;;  %p1712_p7 = scmp.lt.s32.totalorder %s2073_s30, 2 }
  0x27   : > { %s2597_s26 = scalar_select %p2213_p5, 1, 0 }
  0x28   : > { %1691 = dma.hbm_to_vmem [thread:$0]  (!%p2182_p11), %s2595_s1, 2048, %s248_s15, [#allocation6], %s2579_s21, %s2579_s21, %s2580_s22  }
  0x29   : > { %s296_s10 = sand.u32 1, %s2073_s30   ;;  %s298_s14 = sand.u32 1, %s2069_s29  }
  0x2a   : > { %s1461_s20 = sshll.u32 %s298_s14, 7  ;;  %s1539_s17 = sshll.u32 %s2073_s30, 11 }
  0x2b   : > { %s2224_s15 = scalar_lea.hbm %s2566_s0, %s1539_s17  ;;  %s300_s18 = scalar_lea.vmem [#allocation2], %s1461_s20 }
  0x2c   : > { %s308_s19 = sshll.u32 %s300_s18, 4  ;;  %p2228_p2 = pnand %p1712_p7, %p42_p3  ;;  %s2226_s19 = int_to_ptr.vmem [resolvable:$true] %s308_s19 }
  0x2d   : > { %s2235_s14 = scalar_lea.hbm %s2573_s7, %s1539_s17  ;;  %s322_s27 = scalar_lea.vmem [#allocation10], %s1461_s20 }
  0x2e   : > { %s2237_s12 = sshll.u32 %s322_s27, 4  ;;  %s2239_s22 = scalar_lea.sflag [#allocation3], %s296_s10  ;;  %s2270_s12 = int_to_ptr.vmem [resolvable:$true] %s2237_s12 }
  0x2f   : > { %s1889_s1 = scalar_lea.hbm %s2224_s15, 2048  ;;  %p1891_p10 = pneg %p2228_p2 }
  0x30   : > { %p1890_p9 = scmp.ne.s32.totalorder %s2224_s15, %s1889_s1  ;;  %s1894_s21 = scalar_lea.hbm %s2566_s0, 4096 }
  0x31   : > { %p1895_p3 = scmp.lt.s32.totalorder %s2224_s15, %s2566_s0  ;;  %p1896_p7 = scmp.lt.s32.totalorder %s1894_s21, %s1889_s1 }
  0x32   : > { %p1892_p13 = pnand %p1891_p10, %p1890_p9 }
  0x33   : > { %p1897_p1 = por %p1896_p7, %p1895_p3 }
  0x34   : > { %p1893_p0 = pneg %p1892_p13 }
  0x36   : > { %p1898_p12 = pnand %p1897_p1, %p1893_p0 }
  0x38   : > { %1901 = shalt.err (!%p1898_p12)
}
  0x39   : > { %s1902_s10 = scalar_lea.vmem %s2226_s19, 2048  ;;  %s2078_s25 = smov [#allocation2]  }
  0x3a   : > { %p1903_p6 = scmp.ne.s32.totalorder %s2226_s19, %s1902_s10  ;;  %s1907_s20 = sshll.u32 %s2078_s25, 4  ;;  %s1908_s20 = int_to_ptr.vmem [resolvable:$false] %s1907_s20 }
  0x3b   : > { %s1909_s27 = scalar_lea.vmem %s1908_s20, 4096  ;;  %p1910_p5 = scmp.lt.s32.totalorder %s2226_s19, %s1908_s20 }
  0x3c   : > { %p1905_p9 = pnand %p1903_p6, %p1891_p10  ;;  %p1911_p4 = scmp.lt.s32.totalorder %s1909_s27, %s1902_s10 }
  0x3e   : > { %p1906_p13 = pneg %p1905_p9  ;;  %p1912_p8 = por %p1911_p4, %p1910_p5 }
  0x40   : > { %p1913_p3 = pnand %p1912_p8, %p1906_p13 }
  0x42   : > { %1916 = shalt.err (!%p1913_p3)
}
  0x43   : > { %s2586_s1 = smov 128   ;;  %s2080_s18 = smov 8  }
  0x44   : > { %1701 = dma.hbm_to_vmem [thread:$0]  (!%p2228_p2), %s2224_s15, 2048, %s2226_s19, %s2239_s22, %s2586_s1, %s2586_s1, %s2080_s18  }
  0x45   : > { %s2081_s21 = smov [#allocation7]   ;;  %s2082_s17 = smov [#allocation8]  }
  0x46   : > { %s263_s24 = sshll.u32 %s2081_s21, 4  ;;  %s279_s10 = sshll.u32 %s2082_s17, 4  ;;  %s264_s24 = int_to_ptr.vmem [resolvable:$true] %s263_s24  ;;  %s280_s10 = int_to_ptr.vmem [resolvable:$true] %s279_s10 }
  0x47   : > { %s1928_s25 = scalar_lea.vmem %s264_s24, 2048  ;;  %p2599_p4 = pneg %p2182_p11 }
  0x48   : > { %p1929_p1 = scmp.ne.s32.totalorder %s264_s24, %s1928_s25  ;;  %p1936_p12 = scmp.lt.s32.totalorder %s264_s24, %s264_s24 }
  0x49   : > { %p1937_p5 = scmp.lt.s32.totalorder %s1928_s25, %s1928_s25 }
  0x4a   : > { %p1931_p6 = pnand %p1929_p1, %p2599_p4 }
  0x4b   : > { %p1938_p0 = por %p1937_p5, %p1936_p12 }
  0x4c   : > { %p1932_p8 = pneg %p1931_p6 }
  0x4e   : > { %p1939_p7 = pnand %p1938_p0, %p1932_p8 }
  0x50   : > { %1942 = shalt.err (!%p1939_p7)
}
  0x51   : > { %1694 = dma.hbm_to_vmem [thread:$0]  (!%p2182_p11), %s2569_s3, 2048, %s264_s24, [#allocation6], %s2586_s1, %s2586_s1, %s2080_s18  }
  0x52   : > { %s1954_s20 = scalar_lea.vmem %s280_s10, 1024  ;;  %p2600_p13 = pmov %p2599_p4 }
  0x53   : > { %p1955_p9 = scmp.ne.s32.totalorder %s280_s10, %s1954_s20  ;;  %p1962_p4 = scmp.lt.s32.totalorder %s280_s10, %s280_s10 }
  0x54   : > { %p1963_p6 = scmp.lt.s32.totalorder %s1954_s20, %s1954_s20 }
  0x55   : > { %p1957_p3 = pnand %p1955_p9, %p2600_p13 }
  0x56   : > { %p1964_p8 = por %p1963_p6, %p1962_p4 }
  0x57   : > { %p1958_p1 = pneg %p1957_p3 }
  0x59   : > { %p1965_p12 = pnand %p1964_p8, %p1958_p1 }
  0x5b   : > { %1968 = shalt.err (!%p1965_p12)
}
  0x5c   : > { %s2601_s27 = smov 4   ;;  %s2602_s21 = smov 64  }
  0x5d   : > { %1697 = dma.hbm_to_vmem [thread:$0]  (!%p2182_p11), %s2571_s5, 1024, %s280_s10, [#allocation9], %s2602_s21, %s2602_s21, %s2601_s27  }
  0x5e   : > { %s1969_s24 = scalar_lea.hbm %s2235_s14, 2048  ;;  %s1974_s16 = scalar_lea.hbm %s2573_s7, 4096 }
  0x5f   : > { %p1970_p5 = scmp.ne.s32.totalorder %s2235_s14, %s1969_s24  ;;  %p1975_p9 = scmp.lt.s32.totalorder %s2235_s14, %s2573_s7 }
  0x60   : > { %p1976_p13 = scmp.lt.s32.totalorder %s1974_s16, %s1969_s24 }
  0x61   : > { %p1972_p0 = pnand %p1970_p5, %p1891_p10 }
  0x62   : > { %p1977_p3 = por %p1976_p13, %p1975_p9 }
  0x63   : > { %p1973_p7 = pneg %p1972_p0 }
  0x65   : > { %p1978_p1 = pnand %p1977_p3, %p1973_p7 }
  0x67   : > { %1981 = shalt.err (!%p1978_p1)
}
  0x68   : > { %s1982_s10 = scalar_lea.vmem %s2270_s12, 2048  ;;  %s2083_s27 = smov [#allocation10]  }
  0x69   : > { %p1983_p11 = scmp.ne.s32.totalorder %s2270_s12, %s1982_s10  ;;  %s1987_s21 = sshll.u32 %s2083_s27, 4  ;;  %s1988_s21 = int_to_ptr.vmem [resolvable:$false] %s1987_s21 }
  0x6a   : > { %s1989_s17 = scalar_lea.vmem %s1988_s21, 4096  ;;  %p1990_p8 = scmp.lt.s32.totalorder %s2270_s12, %s1988_s21 }
  0x6b   : > { %p1985_p4 = pnand %p1983_p11, %p1891_p10  ;;  %p1991_p12 = scmp.lt.s32.totalorder %s1989_s17, %s1982_s10 }
  0x6d   : > { %p1986_p6 = pneg %p1985_p4  ;;  %p1992_p5 = por %p1991_p12, %p1990_p8 }
  0x6f   : > { %p1993_p0 = pnand %p1992_p5, %p1986_p6 }
  0x71   : > { %1996 = shalt.err (!%p1993_p0)
}
  0x72   : > { %s2603_s1 = smov 128   ;;  %p2604_p10 = scmp.ne.s32.totalorder %s2592_s13, 0 }
  0x73   : > { %1704 = dma.hbm_to_vmem [thread:$0]  (!%p2228_p2), %s2235_s14, 2048, %s2270_s12, %s2239_s22, %s2603_s1, %s2603_s1, %s2080_s18  }
  0x74   : > { %341 = sbr.rel (%p2604_p10) target bundleno = 869 (0x365), region = 52  ;;  %s343_s25 = sand.u32 (!%p2604_p10), 1, %s2154_s9  }
  0x75   : > { %s345_s24 = sand.u32 (!%p2604_p10), 1, %s2065_s28   ;;  %s344_s23 = scalar_lea.sflag (!%p2604_p10), [#allocation3], %s343_s25 }
  0x76   : > { %s2326_s15 = sshll.u32 (!%p2604_p10), %s345_s24, 7  ;;  %p2605_p7 = scmp.ne.s32.totalorder (!%p2604_p10), %s2589_s11, 0 }
  0x77   : > { %s2329_s19 = scalar_lea.vmem (!%p2604_p10), [#allocation2], %s2326_s15 }
  0x79   : > { %2040 = dma.done.wait (%p2605_p7), %s344_s23, 2048  }
  0x7a   : > { %2042 = vsyncadd (%p2605_p7), %s344_s23, 4294965248  ;;  %p2606_p2 = scmp.eq.s32.totalorder %s2154_s9, 0 }
  0x7c   : > { %2044 = dma.done.wait (%p2606_p2), [#allocation6], 4096   ;;  %p2607_p9 = pmov %p2606_p2 }
  0x7d   : > { %p2608_p13 = pmov %p2606_p2 }
  0x7e   : > { %2046 = vsyncadd (%p2607_p9), [#allocation6], 4294963200 }
  0x7f   : > { %2048 = dma.done.wait (%p2608_p13), [#allocation9], 1024   ;;  %p2609_p3 = pmov %p2606_p2 }
  0x80   : > { %s2344_s13 = scalar_lea.vmem [#allocation10], %s2326_s15 }
  0x81   : > { %2050 = vsyncadd (%p2609_p3), [#allocation9], 4294966272 }
  0x82   : > { %2052 = dma.done.wait (%p2605_p7), %s344_s23, 2048  }
  0x83   : > { %2054 = vsyncadd (%p2605_p7), %s344_s23, 4294965248  ;;  %v1759_v0 = vld [vmem:[#allocation5 + $0x78] sm:$0xff]   ;;  %v1761_v2 = vld [vmem:[#allocation5 + $0x70] sm:$0xff]   ;;  %v2084_v48 = vmov 0   ;;  %s2496_s20 = scalar_lea.vmem [#allocation11], %s2326_s15  ;;  %s1541_s10 = sshll.u32 %s2154_s9, 11 }
  0x84   : > { %v1760_v1 = vld [vmem:[#allocation5 + $0x38] sm:$0xff]   ;;  %1542 = vmatprep.subr.bf16.mxu0 %v1759_v0  ;;  %v1762_v3 = vld [vmem:[#allocation5 + $0x30] sm:$0xff]   ;;  %v1763_v4 = vld [vmem:[#allocation5 + $0x68] sm:$0xff]   ;;  %902 = vmatprep.mubr.bf16.mxu1 %v2084_v48  ;;  %s1333_s27 = sshll.u32 %s2496_s20, 4  ;;  %s2517_s1 = scalar_lea.hbm %s2574_s8, %s1541_s10  ;;  %s2519_s27 = int_to_ptr.vmem [resolvable:$true] %s1333_s27 }
  0x85   : > { %1543 = vmatpush3.bf16.msra.mxu0 %v1760_v1  ;;  %v1764_v5 = vld [vmem:[#allocation5 + $0x28] sm:$0xff]   ;;  %v1765_v6 = vld [vmem:[#allocation5 + $0x60] sm:$0xff]   ;;  %v1767_v8 = vld [vmem:[#allocation5 + $0x58] sm:$0xff]   ;;  %s2525_s9 = scalar_lea.sflag [#allocation4], %s345_s24  ;;  %s1997_s25 = scalar_lea.vmem %s2519_s27, 2048 }
  0x86   : > { %1544 = vmatprep.subr.bf16.mxu0 %v1761_v2  ;;  %v1766_v7 = vld [vmem:[#allocation5 + $0x20] sm:$0xff]   ;;  %v1768_v9 = vld [vmem:[#allocation5 + $0x18] sm:$0xff]   ;;  %v1769_v10 = vld [vmem:[#allocation5 + $0x50] sm:$0xff]   ;;  %p1998_p1 = scmp.ne.s32.totalorder %s2519_s27, %s1997_s25  ;;  %p2610_p11 = scmp.ne.s32.totalorder %s2597_s26, 0 }
  0x87   : > { %v1777_v11 = vld [vmem:[%s2329_s19 + $0x4] ss:$8 sps:$4 sm:$0xff]   ;;  %v1770_v12 = vld [vmem:[#allocation5 + $0x10] sm:$0xff]   ;;  %v1775_v20 = vld [vmem:[%s2329_s19] ss:$8 sps:$4 sm:$0xff]   ;;  %s2085_s15 = smov [#allocation11]  }
  0x88   : > { %673 = vmatprep.mubr.bf16.mxu0 %v1777_v11  ;;  %v1771_v13 = vld [vmem:[#allocation5 + $0x48] sm:$0xff]   ;;  %v1773_v15 = vld [vmem:[#allocation5 + $0x40] sm:$0xff]   ;;  %v1799_v17 = vld [vmem:[#allocation7 + $0x74] ss:$8 sps:$4 sm:$0xff]   ;;  %p1999_p4 = pnand %p1998_p1, %p2610_p11  ;;  %s2001_s23 = sshll.u32 %s2085_s15, 4  ;;  %s2002_s23 = int_to_ptr.vmem [resolvable:$false] %s2001_s23 }
  0x89   : > { %1545 = vmatpush3.bf16.msra.mxu0 %v1762_v3  ;;  %v1772_v14 = vld [vmem:[#allocation5 + $0x8] sm:$0xff]   ;;  %v1774_v16 = vld [vmem:[#allocation5] sm:$0xff]   ;;  %v1801_v18 = vld [vmem:[#allocation7 + $0x70] ss:$8 sps:$4 sm:$0xff]   ;;  %870 = vmatprep.subr.bf16.mxu1 %v1799_v17  ;;  %p2004_p8 = scmp.lt.s32.totalorder %s2519_s27, %s2002_s23 }
  0x8a   : > { %1546 = vmatprep.subr.bf16.mxu0 %v1763_v4  ;;  %v1802_v19 = vld [vmem:[#allocation7 + $0x64] ss:$8 sps:$4 sm:$0xff]   ;;  %871 = vmatpush1.bf16.msra.mxu1 %v1801_v18  ;;  %v1804_v21 = vld [vmem:[#allocation7 + $0x60] ss:$8 sps:$4 sm:$0xff]   ;;  %v1778_v22 = vld [vmem:[%s2329_s19 + $0x14] ss:$8 sps:$4 sm:$0xff]   ;;  %p2000_p6 = pneg %p1999_p4 }
  0x8b   : > { %872 = vmatprep.subr.bf16.mxu1 %v1802_v19  ;;  %v1805_v23 = vld [vmem:[#allocation7 + $0x54] ss:$8 sps:$4 sm:$0xff]   ;;  %v1807_v24 = vld [vmem:[#allocation7 + $0x50] ss:$8 sps:$4 sm:$0xff]   ;;  %v1808_v25 = vld [vmem:[#allocation7 + $0x44] ss:$8 sps:$4 sm:$0xff]  }
  0x8c   : > { %v1780_v26 = vld [vmem:[%s2329_s19 + $0x10] ss:$8 sps:$4 sm:$0xff]   ;;  %v1810_v27 = vld [vmem:[#allocation7 + $0x40] ss:$8 sps:$4 sm:$0xff]   ;;  %v1781_v28 = vld [vmem:[%s2329_s19 + $0x24] ss:$8 sps:$4 sm:$0xff]  }
  0x8d   : > { %1547 = vmatpush3.bf16.msra.mxu0 %v1764_v5  ;;  %v1811_v29 = vld [vmem:[#allocation7 + $0x34] ss:$8 sps:$4 sm:$0xff]   ;;  %v1783_v30 = vld [vmem:[%s2329_s19 + $0x20] ss:$8 sps:$4 sm:$0xff]   ;;  %v1786_v32 = vld [vmem:[%s2329_s19 + $0x30] ss:$8 sps:$4 sm:$0xff]  }
  0x8e   : > { %1548 = vmatprep.subr.bf16.mxu0 %v1765_v6  ;;  %873 = vmatpush1.bf16.msra.mxu1 %v1804_v21  ;;  %v1784_v31 = vld [vmem:[%s2329_s19 + $0x34] ss:$8 sps:$4 sm:$0xff]   ;;  %v1787_v33 = vld [vmem:[%s2329_s19 + $0x44] ss:$8 sps:$4 sm:$0xff]   ;;  %v1789_v34 = vld [vmem:[%s2329_s19 + $0x40] ss:$8 sps:$4 sm:$0xff]  }
  0x8f   : > { %874 = vmatprep.subr.bf16.mxu1 %v1805_v23  ;;  %v1790_v35 = vld [vmem:[%s2329_s19 + $0x54] ss:$8 sps:$4 sm:$0xff]   ;;  %v1792_v36 = vld [vmem:[%s2329_s19 + $0x50] ss:$8 sps:$4 sm:$0xff]   ;;  %v1793_v37 = vld [vmem:[%s2329_s19 + $0x64] ss:$8 sps:$4 sm:$0xff]  }
  0x90   : > { %v1795_v38 = vld [vmem:[%s2329_s19 + $0x60] ss:$8 sps:$4 sm:$0xff]   ;;  %v1796_v39 = vld [vmem:[%s2329_s19 + $0x74] ss:$8 sps:$4 sm:$0xff]   ;;  %v1798_v40 = vld [vmem:[%s2329_s19 + $0x70] ss:$8 sps:$4 sm:$0xff]  }
  0x91   : > { %1549 = vmatpush3.bf16.msra.mxu0 %v1766_v7  ;;  %v1813_v41 = vld [vmem:[#allocation7 + $0x30] ss:$8 sps:$4 sm:$0xff]   ;;  %v1814_v42 = vld [vmem:[#allocation7 + $0x24] ss:$8 sps:$4 sm:$0xff]   ;;  %v1816_v43 = vld [vmem:[#allocation7 + $0x20] ss:$8 sps:$4 sm:$0xff]  }
  0x92   : > { %1550 = vmatprep.subr.bf16.mxu0 %v1767_v8  ;;  %875 = vmatpush1.bf16.msra.mxu1 %v1807_v24  ;;  %v1817_v44 = vld [vmem:[#allocation7 + $0x14] ss:$8 sps:$4 sm:$0xff]   ;;  %v1819_v45 = vld [vmem:[#allocation7 + $0x10] ss:$8 sps:$4 sm:$0xff]   ;;  %v1820_v46 = vld [vmem:[#allocation7 + $0x4] ss:$8 sps:$4 sm:$0xff]  }
  0x93   : > { %876 = vmatprep.subr.bf16.mxu1 %v1808_v25  ;;  %v1822_v47 = vld [vmem:[#allocation7] ss:$8 sps:$4 sm:$0xff]   ;;  %s2003_s19 = scalar_lea.vmem %s2002_s23, 4096 }
  0x94   : > { %v2370_v52 = vld [vmem:[%s2568_s2] ss:$0 sm:$0xff]  ;;  %p2005_p12 = scmp.lt.s32.totalorder %s2003_s19, %s1997_s25 }
  0x95   : > { %1551 = vmatpush3.bf16.msra.mxu0 %v1768_v9 }
  0x96   : > { %1552 = vmatprep.subr.bf16.mxu0 %v1769_v10  ;;  %877 = vmatpush1.bf16.msra.mxu1 %v1810_v27  ;;  %p2006_p5 = por %p2005_p12, %p2004_p8 }
  0x97   : > { %878 = vmatprep.subr.bf16.mxu1 %v1811_v29 }
  0x98   : > { %p2007_p0 = pnand %p2006_p5, %p2000_p6 }
  0x99   : > { %1553 = vmatpush3.bf16.msra.mxu0 %v1770_v12 }
  0x9a   : > { %1554 = vmatprep.subr.bf16.mxu0 %v1771_v13  ;;  %879 = vmatpush1.bf16.msra.mxu1 %v1813_v41 }
  0x9b   : > { %880 = vmatprep.subr.bf16.mxu1 %v1814_v42 }
  0x9d   : > { %1555 = vmatpush3.bf16.msra.mxu0 %v1772_v14 }
  0x9e   : > { %1556 = vmatprep.subr.bf16.mxu0 %v1773_v15  ;;  %881 = vmatpush1.bf16.msra.mxu1 %v1816_v43 }
  0x9f   : > { %882 = vmatprep.subr.bf16.mxu1 %v1817_v44 }
  0xa1   : > { %1557 = vmatpush3.bf16.msra.mxu0 %v1774_v16 }
  0xa2   : > { %883 = vmatpush1.bf16.msra.mxu1 %v1819_v45 }
  0xa3   : > { %884 = vmatprep.subr.bf16.mxu1 %v1820_v46 }
  0xa4   : > { %674 = vmatmul.mubr.bf16.vlgmr.msra.gmra.mxu0 %v1775_v20 }
  0xa5   : > { %681 = vmatprep.mubr.bf16.mxu0 %v1778_v22 }
  0xa6   : > { %885 = vmatpush1.bf16.msra.mxu1 %v1822_v47 }
  0xac   : > { %682 = vmatmul.mubr.bf16.gmra.mxu0 %v1780_v26 }
  0xad   : > { %689 = vmatprep.mubr.bf16.mxu0 %v1781_v28 }
  0xb4   : > { %690 = vmatmul.mubr.bf16.gmra.mxu0 %v1783_v30 }
  0xb5   : > { %697 = vmatprep.mubr.bf16.mxu0 %v1784_v31 }
  0xbc   : > { %698 = vmatmul.mubr.bf16.gmra.mxu0 %v1786_v32 }
  0xbd   : > { %705 = vmatprep.mubr.bf16.mxu0 %v1787_v33 }
  0xc4   : > { %706 = vmatmul.mubr.bf16.gmra.mxu0 %v1789_v34 }
  0xc5   : > { %713 = vmatprep.mubr.bf16.mxu0 %v1790_v35 }
  0xcc   : > { %714 = vmatmul.mubr.bf16.gmra.mxu0 %v1792_v36 }
  0xcd   : > { %721 = vmatprep.mubr.bf16.mxu0 %v1793_v37 }
  0xd4   : > { %722 = vmatmul.mubr.bf16.gmra.mxu0 %v1795_v38 }
  0xd5   : > { %729 = vmatprep.mubr.bf16.mxu0 %v1796_v39 }
  0xdc   : > { %730 = vmatmul.mubr.bf16.gmra.mxu0 %v1798_v40 }
 0x164   : > { %v1558_v49 = vpop.f32.mrf.mxu0 }
 0x166   : > { %v1559_v50 = vpop.f32.mrf.mxu0 }
 0x167   : > { %v1560_v51 = vadd.f32 %v1559_v50, %v1558_v49 }
 0x168   : > { %v1561_v53 = vpop.f32.mrf.mxu0 }
 0x169   : > { %v676_v55 = vadd.f32 %v1560_v51, %v2370_v52 }
 0x16a   : > { %v1562_v54 = vpop.f32.mrf.mxu0 }
 0x16b   : > { %v1563_v56 = vadd.f32 %v1562_v54, %v1561_v53  ;;  %v738_v60 = vmax.f32 %v676_v55, 0.0 }
 0x16c   : > { %v1564_v57 = vpop.f32.mrf.mxu0 }
 0x16d   : > { %v679_v58 = vadd.f32 %v1563_v56, %v2370_v52 }
 0x16e   : > { %v1565_v59 = vpop.f32.mrf.mxu0 }
 0x16f   : > { %v739_v61 = vmax.f32 %v679_v58, 0.0  ;;  %v1566_v62 = vadd.f32 %v1565_v59, %v1564_v57 }
 0x170   : > { %v1567_v63 = vpop.f32.mrf.mxu0 }
 0x171   : > { %v754_v0 = vpack.c.bf16 %v739_v61, %v738_v60  ;;  %v684_v2 = vadd.f32 %v1566_v62, %v2370_v52 }
 0x172   : > { %v1568_v1 = vpop.f32.mrf.mxu0 }
 0x173   : > { %v1569_v3 = vadd.f32 %v1568_v1, %v1567_v63  ;;  %903 = vmatmul.mubr.bf16.vlgmr.msra.gmra.mxu1 %v754_v0  ;;  %v740_v7 = vmax.f32 %v684_v2, 0.0 }
 0x174   : > { %v1570_v4 = vpop.f32.mrf.mxu0  ;;  %912 = vmatprep.mubr.bf16.mxu1 %v2084_v48 }
 0x175   : > { %v687_v5 = vadd.f32 %v1569_v3, %v2370_v52 }
 0x176   : > { %v1571_v6 = vpop.f32.mrf.mxu0 }
 0x177   : > { %v741_v8 = vmax.f32 %v687_v5, 0.0  ;;  %v1572_v9 = vadd.f32 %v1571_v6, %v1570_v4 }
 0x178   : > { %v1573_v10 = vpop.f32.mrf.mxu0 }
 0x179   : > { %v755_v11 = vpack.c.bf16 %v741_v8, %v740_v7  ;;  %v692_v13 = vadd.f32 %v1572_v9, %v2370_v52 }
 0x17a   : > { %v1574_v12 = vpop.f32.mrf.mxu0 }
 0x17b   : > { %v1575_v14 = vadd.f32 %v1574_v12, %v1573_v10  ;;  %913 = vmatmul.mubr.bf16.gmra.mxu1 %v755_v11  ;;  %v742_v18 = vmax.f32 %v692_v13, 0.0  ;;  %v1823_v12 = vld [vmem:[#allocation8 + $0x38] sm:$0xff]   ;;  %v1824_v13 = vld [vmem:[#allocation8 + $0x30] sm:$0xff]  }
 0x17c   : > { %v1576_v15 = vpop.f32.mrf.mxu0  ;;  %922 = vmatprep.mubr.bf16.mxu1 %v2084_v48  ;;  %1622 = vmatprep.subr.bf16.mxu0 %v1823_v12 }
 0x17d   : > { %v695_v16 = vadd.f32 %v1575_v14, %v2370_v52  ;;  %1654 = vmatprep.subr.bf16.mxu1 %v1823_v12  ;;  %1623 = vmatpush3.bf16.msra.mxu0 %v1823_v12  ;;  %v1825_v14 = vld [vmem:[#allocation8 + $0x28] sm:$0xff]  }
 0x17e   : > { %v1577_v17 = vpop.f32.mrf.mxu0  ;;  %1662 = vmatpush3.bf16.msra.mxu1 %v1823_v12  ;;  %1624 = vmatprep.subr.bf16.mxu0 %v1824_v13 }
 0x17f   : > { %v743_v19 = vmax.f32 %v695_v16, 0.0  ;;  %v1578_v20 = vadd.f32 %v1577_v17, %v1576_v15  ;;  %1655 = vmatprep.subr.bf16.mxu1 %v1824_v13  ;;  %v1828_v15 = vld [vmem:[#allocation8 + $0x10] sm:$0xff]   ;;  %v1829_v16 = vld [vmem:[#allocation8 + $0x8] sm:$0xff]   ;;  %v1830_v17 = vld [vmem:[#allocation8] sm:$0xff]  }
 0x180   : > { %v1579_v21 = vpop.f32.mrf.mxu0 }
 0x181   : > { %v756_v22 = vpack.c.bf16 %v743_v19, %v742_v18  ;;  %v700_v24 = vadd.f32 %v1578_v20, %v2370_v52  ;;  %1625 = vmatpush3.bf16.msra.mxu0 %v1824_v13  ;;  %v780_v18 = vlaneseq }
 0x182   : > { %v1580_v23 = vpop.f32.mrf.mxu0  ;;  %1663 = vmatpush3.bf16.msra.mxu1 %v1824_v13  ;;  %1626 = vmatprep.subr.bf16.mxu0 %v1825_v14 }
 0x183   : > { %v1581_v25 = vadd.f32 %v1580_v23, %v1579_v21  ;;  %923 = vmatmul.mubr.bf16.gmra.mxu1 %v756_v22  ;;  %v744_v29 = vmax.f32 %v700_v24, 0.0  ;;  %1656 = vmatprep.subr.bf16.mxu1 %v1825_v14  ;;  %v781_v19 = vshrl.u32 %v780_v18, 7  ;;  %v778_v21 = vld [vmem:[%s2570_s4] sm:$0x3] }
 0x184   : > { %v1582_v26 = vpop.f32.mrf.mxu0  ;;  %932 = vmatprep.mubr.bf16.mxu1 %v2084_v48 }
 0x185   : > { %v703_v27 = vadd.f32 %v1581_v25, %v2370_v52  ;;  %1627 = vmatpush3.bf16.msra.mxu0 %v1825_v14  ;;  %v786_v20 = vsub.s32 1, %v781_v19 }
 0x186   : > { %v1583_v28 = vpop.f32.mrf.mxu0  ;;  %1664 = vmatpush3.bf16.msra.mxu1 %v1825_v14 }
 0x187   : > { %v745_v30 = vmax.f32 %v703_v27, 0.0  ;;  %v1584_v31 = vadd.f32 %v1583_v28, %v1582_v26  ;;  %v2398_v22 = vrot.slane %v778_v21, %v786_v20 }
 0x188   : > { %v1585_v32 = vpop.f32.mrf.mxu0 }
 0x189   : > { %v757_v33 = vpack.c.bf16 %v745_v30, %v744_v29  ;;  %v708_v35 = vadd.f32 %v1584_v31, %v2370_v52 }
 0x18a   : > { %v1586_v34 = vpop.f32.mrf.mxu0 }
 0x18b   : > { %v1587_v36 = vadd.f32 %v1586_v34, %v1585_v32  ;;  %933 = vmatmul.mubr.bf16.gmra.mxu1 %v757_v33  ;;  %v746_v40 = vmax.f32 %v708_v35, 0.0 }
 0x18c   : > { %v1588_v37 = vpop.f32.mrf.mxu0  ;;  %942 = vmatprep.mubr.bf16.mxu1 %v2084_v48 }
 0x18d   : > { %v711_v38 = vadd.f32 %v1587_v36, %v2370_v52 }
 0x18e   : > { %v1589_v39 = vpop.f32.mrf.mxu0 }
 0x18f   : > { %v747_v41 = vmax.f32 %v711_v38, 0.0  ;;  %v1590_v42 = vadd.f32 %v1589_v39, %v1588_v37 }
 0x190   : > { %v1591_v43 = vpop.f32.mrf.mxu0 }
 0x191   : > { %v758_v44 = vpack.c.bf16 %v747_v41, %v746_v40  ;;  %v716_v46 = vadd.f32 %v1590_v42, %v2370_v52 }
 0x192   : > { %v1592_v45 = vpop.f32.mrf.mxu0 }
 0x193   : > { %v1593_v47 = vadd.f32 %v1592_v45, %v1591_v43  ;;  %943 = vmatmul.mubr.bf16.gmra.mxu1 %v758_v44  ;;  %v748_v53 = vmax.f32 %v716_v46, 0.0  ;;  %v782_v43 = vsub.s32 0, %v781_v19 }
 0x194   : > { %v1594_v49 = vpop.f32.mrf.mxu0  ;;  %952 = vmatprep.mubr.bf16.mxu1 %v2084_v48 }
 0x195   : > { %v719_v50 = vadd.f32 %v1593_v47, %v2370_v52 }
 0x196   : > { %v1595_v51 = vpop.f32.mrf.mxu0 }
 0x197   : > { %v749_v54 = vmax.f32 %v719_v50, 0.0  ;;  %v1596_v55 = vadd.f32 %v1595_v51, %v1594_v49  ;;  %v1079_v50 = vld [vmem:[%s2344_s13] sm:$0xff] }
 0x198   : > { %v1597_v56 = vpop.f32.mrf.mxu0 }
 0x199   : > { %v759_v57 = vpack.c.bf16 %v749_v54, %v748_v53  ;;  %v724_v59 = vadd.f32 %v1596_v55, %v2370_v52  ;;  %v2415_v53 = vrot.slane %v778_v21, %v782_v43 }
 0x19a   : > { %v1598_v58 = vpop.f32.mrf.mxu0 }
 0x19b   : > { %v1599_v60 = vadd.f32 %v1598_v58, %v1597_v56  ;;  %953 = vmatmul.mubr.bf16.gmra.mxu1 %v759_v57  ;;  %v750_v0 = vmax.f32 %v724_v59, 0.0  ;;  %v1080_v59 = vld [vmem:[%s2344_s13 + $0x8] sm:$0xff] }
 0x19c   : > { %v1600_v61 = vpop.f32.mrf.mxu0  ;;  %962 = vmatprep.mubr.bf16.mxu1 %v2084_v48 }
 0x19d   : > { %v727_v62 = vadd.f32 %v1599_v60, %v2370_v52 }
 0x19e   : > { %v1601_v63 = vpop.f32.mrf.mxu0 }
 0x19f   : > { %v751_v1 = vmax.f32 %v727_v62, 0.0  ;;  %v1602_v2 = vadd.f32 %v1601_v63, %v1600_v61 }
 0x1a0   : > { %v1603_v3 = vpop.f32.mrf.mxu0 }
 0x1a1   : > { %v760_v4 = vpack.c.bf16 %v751_v1, %v750_v0  ;;  %v732_v6 = vadd.f32 %v1602_v2, %v2370_v52 }
 0x1a2   : > { %v1604_v5 = vpop.f32.mrf.mxu0 }
 0x1a3   : > { %v1605_v7 = vadd.f32 %v1604_v5, %v1603_v3  ;;  %963 = vmatmul.mubr.bf16.gmra.mxu1 %v760_v4  ;;  %v752_v9 = vmax.f32 %v732_v6, 0.0 }
 0x1a4   : > { %972 = vmatprep.mubr.bf16.mxu1 %v2084_v48  ;;  %v1826_v48 = vld [vmem:[#allocation8 + $0x20] sm:$0xff]  }
 0x1a5   : > { %v735_v8 = vadd.f32 %v1605_v7, %v2370_v52  ;;  %1628 = vmatprep.subr.bf16.mxu0 %v1826_v48  ;;  %1657 = vmatprep.subr.bf16.mxu1 %v1826_v48  ;;  %v1827_v52 = vld [vmem:[#allocation8 + $0x18] sm:$0xff]  }
 0x1a6   : > { %1629 = vmatpush3.bf16.msra.mxu0 %v1826_v48  ;;  %1665 = vmatpush3.bf16.msra.mxu1 %v1826_v48 }
 0x1a7   : > { %v753_v10 = vmax.f32 %v735_v8, 0.0  ;;  %1630 = vmatprep.subr.bf16.mxu0 %v1827_v52  ;;  %1658 = vmatprep.subr.bf16.mxu1 %v1827_v52 }
 0x1a9   : > { %v761_v11 = vpack.c.bf16 %v753_v10, %v752_v9  ;;  %v1081_v10 = vld [vmem:[%s2344_s13 + $0x10] sm:$0xff] }
 0x1aa   : > { %1631 = vmatpush3.bf16.msra.mxu0 %v1827_v52  ;;  %1666 = vmatpush3.bf16.msra.mxu1 %v1827_v52 }
 0x1ab   : > { %973 = vmatmul.mubr.bf16.gmra.mxu1 %v761_v11  ;;  %1632 = vmatprep.subr.bf16.mxu0 %v1828_v15 }
 0x1ac   : > { %1659 = vmatprep.subr.bf16.mxu1 %v1828_v15 }
 0x1ae   : > { %1633 = vmatpush3.bf16.msra.mxu0 %v1828_v15  ;;  %1667 = vmatpush3.bf16.msra.mxu1 %v1828_v15 }
 0x1af   : > { %1634 = vmatprep.subr.bf16.mxu0 %v1829_v16  ;;  %1660 = vmatprep.subr.bf16.mxu1 %v1829_v16 }
 0x1b2   : > { %1635 = vmatpush3.bf16.msra.mxu0 %v1829_v16  ;;  %1668 = vmatpush3.bf16.msra.mxu1 %v1829_v16  ;;  %v1082_v16 = vld [vmem:[%s2344_s13 + $0x18] sm:$0xff] }
 0x1b3   : > { %1636 = vmatprep.subr.bf16.mxu0 %v1830_v17  ;;  %1661 = vmatprep.subr.bf16.mxu1 %v1830_v17 }
 0x1b6   : > { %1637 = vmatpush3.bf16.msra.mxu0 %v1830_v17  ;;  %1669 = vmatpush3.bf16.msra.mxu1 %v1830_v17 }
 0x233   : > { %v904_v23 = vpop.f32.mrf.mxu1 }
 0x234   : > { %v905_v63 = vadd.f32 %v904_v23, %v2415_v53 }
 0x235   : > { %v906_v24 = vpop.f32.mrf.mxu1 }
 0x236   : > { %v907_v25 = vadd.f32 %v906_v24, %v2398_v22 }
 0x237   : > { %v908_v26 = vpop.f32.mrf.mxu1 }
 0x238   : > { %v983_v27 = vmul.f32 1.442695, %v907_v25  ;;  %v909_v2 = vadd.f32 %v908_v26, %v2415_v53 }
 0x239   : > { %v910_v28 = vpop.f32.mrf.mxu1 }
 0x23a   : > { %1831 = vpow2.f32 %v983_v27  ;;  %v911_v29 = vadd.f32 %v910_v28, %v2398_v22 }
 0x23b   : > { %v2402_v30 = vpop.f32.mrf.mxu1 }
 0x23c   : > { %v985_v31 = vmul.f32 1.442695, %v911_v29  ;;  %v915_v20 = vadd.f32 %v2402_v30, %v2415_v53 }
 0x23d   : > { %v916_v32 = vpop.f32.mrf.mxu1 }
 0x23e   : > { %1833 = vpow2.f32 %v985_v31  ;;  %v917_v33 = vadd.f32 %v916_v32, %v2398_v22 }
 0x23f   : > { %v2405_v34 = vpop.f32.mrf.mxu1 }
 0x240   : > { %v987_v35 = vmul.f32 1.442695, %v917_v33  ;;  %v919_v24 = vadd.f32 %v2405_v34, %v2415_v53  ;;  %v1083_v33 = vld [vmem:[%s2344_s13 + $0x20] sm:$0xff] }
 0x241   : > { %v920_v36 = vpop.f32.mrf.mxu1 }
 0x242   : > { %1835 = vpow2.f32 %v987_v35  ;;  %v921_v37 = vadd.f32 %v920_v36, %v2398_v22 }
 0x243   : > { %v2408_v38 = vpop.f32.mrf.mxu1 }
 0x244   : > { %v989_v39 = vmul.f32 1.442695, %v921_v37 }
 0x245   : > { %v926_v40 = vpop.f32.mrf.mxu1 }
 0x246   : > { %1837 = vpow2.f32 %v989_v39  ;;  %v927_v41 = vadd.f32 %v926_v40, %v2398_v22 }
 0x247   : > { %v1832_v42 = vpop.eup %1831  ;;  %v2411_v44 = vpop.f32.mrf.mxu1 }
 0x248   : > { %v991_v45 = vmul.f32 1.442695, %v927_v41  ;;  %vm1015_vm0 = vcmp.ne.f32.partialorder %v1832_v42, %v1832_v42  ;;  %v1084_v41 = vld [vmem:[%s2344_s13 + $0x28] sm:$0xff] }
 0x249   : > { %v930_v46 = vpop.f32.mrf.mxu1  ;;  %v1031_v47 = vsel %vm1015_vm0, 0.01, %v1832_v42 }
 0x24a   : > { %1839 = vpow2.f32 %v991_v45  ;;  %v931_v49 = vadd.f32 %v930_v46, %v2398_v22  ;;  %vm1047_vm1 = vcmp.eq.f32.partialorder %v1031_v47, inf  ;;  %v925_v46 = vadd.f32 %v2408_v38, %v2415_v53 }
 0x24b   : > { %v1834_v51 = vpop.eup %1833  ;;  %v2417_v54 = vpop.f32.mrf.mxu1  ;;  %v1063_v55 = vsel %vm1047_vm1, 3.4028235e+38, %v1031_v47 }
 0x24c   : > { %v993_v56 = vmul.f32 1.442695, %v931_v49  ;;  %vm1016_vm2 = vcmp.ne.f32.partialorder %v1834_v51, %v1834_v51  ;;  %v1095_v60 = vmul.f32 %v1079_v50, %v1063_v55  ;;  %v929_v50 = vadd.f32 %v2411_v44, %v2415_v53 }
 0x24d   : > { %v936_v57 = vpop.f32.mrf.mxu1  ;;  %v1032_v58 = vsel %vm1016_vm2, 0.01, %v1834_v51 }
 0x24e   : > { %1841 = vpow2.f32 %v993_v56  ;;  %v937_v61 = vadd.f32 %v936_v57, %v2398_v22  ;;  %vm1048_vm3 = vcmp.eq.f32.partialorder %v1032_v58, inf  ;;  %v1111_v7 = vadd.f32 %v1095_v60, %v905_v63 }
 0x24f   : > { %v1836_v62 = vpop.eup %1835  ;;  %v2422_v0 = vpop.f32.mrf.mxu1  ;;  %v1064_v1 = vsel %vm1048_vm3, 3.4028235e+38, %v1032_v58 }
 0x250   : > { %vm1017_vm4 = vcmp.ne.f32.partialorder %v1836_v62, %v1836_v62  ;;  %v995_v3 = vmul.f32 1.442695, %v937_v61  ;;  %v1096_v4 = vmul.f32 %v1080_v59, %v1064_v1  ;;  %v1085_v61 = vld [vmem:[%s2344_s13 + $0x30] sm:$0xff] }
 0x251   : > { %v1033_v5 = vsel %vm1017_vm4, 0.01, %v1836_v62  ;;  %v940_v6 = vpop.f32.mrf.mxu1 }
 0x252   : > { %vm1049_vm5 = vcmp.eq.f32.partialorder %v1033_v5, inf  ;;  %1843 = vpow2.f32 %v995_v3  ;;  %v941_v8 = vadd.f32 %v940_v6, %v2398_v22  ;;  %v1112_v9 = vadd.f32 %v1096_v4, %v909_v2  ;;  %v1086_v4 = vld [vmem:[%s2344_s13 + $0x38] sm:$0xff] }
 0x253   : > { %v1838_v11 = vpop.eup %1837  ;;  %v1065_v12 = vsel %vm1049_vm5, 3.4028235e+38, %v1033_v5  ;;  %v2427_v13 = vpop.f32.mrf.mxu1 }
 0x254   : > { %vm1018_vm6 = vcmp.ne.f32.partialorder %v1838_v11, %v1838_v11  ;;  %v997_v14 = vmul.f32 1.442695, %v941_v8  ;;  %v1127_v48 = vpack.c.bf16 %v1112_v9, %v1111_v7  ;;  %v1097_v17 = vmul.f32 %v1081_v10, %v1065_v12 }
 0x255   : > { %v1034_v52 = vsel %vm1018_vm6, 0.01, %v1838_v11  ;;  %v946_v15 = vpop.f32.mrf.mxu1  ;;  %v935_v8 = vadd.f32 %v2417_v54, %v2415_v53  ;;  %v939_v11 = vadd.f32 %v2422_v0, %v2415_v53 }
 0x256   : > { %vm1050_vm7 = vcmp.eq.f32.partialorder %v1034_v52, inf  ;;  %1845 = vpow2.f32 %v997_v14  ;;  %v947_v18 = vadd.f32 %v946_v15, %v2398_v22  ;;  %1638 = vmatprep.mubr.bf16.mxu0 %v1127_v48  ;;  %v1113_v28 = vadd.f32 %v1097_v17, %v915_v20 }
 0x257   : > { %v1840_v19 = vpop.eup %1839  ;;  %v1066_v21 = vsel %vm1050_vm7, 3.4028235e+38, %v1034_v52  ;;  %v2433_v23 = vpop.f32.mrf.mxu1 }
 0x258   : > { %v999_v25 = vmul.f32 1.442695, %v947_v18  ;;  %v1098_v26 = vmul.f32 %v1082_v16, %v1066_v21  ;;  %vm1019_vm8 = vcmp.ne.f32.partialorder %v1840_v19, %v1840_v19  ;;  %v1087_v18 = vld [vmem:[%s2344_s13 + $0x40] sm:$0xff] }
 0x259   : > { %v950_v27 = vpop.f32.mrf.mxu1  ;;  %v1035_v29 = vsel %vm1019_vm8, 0.01, %v1840_v19 }
 0x25a   : > { %1847 = vpow2.f32 %v999_v25  ;;  %v951_v31 = vadd.f32 %v950_v27, %v2398_v22  ;;  %v1114_v32 = vadd.f32 %v1098_v26, %v919_v24  ;;  %vm1051_vm9 = vcmp.eq.f32.partialorder %v1035_v29, inf  ;;  %v1088_v26 = vld [vmem:[%s2344_s13 + $0x48] sm:$0xff] }
 0x25b   : > { %v1842_v30 = vpop.eup %1841  ;;  %v2439_v35 = vpop.f32.mrf.mxu1  ;;  %v1067_v36 = vsel %vm1051_vm9, 3.4028235e+38, %v1035_v29 }
 0x25c   : > { %v1001_v37 = vmul.f32 1.442695, %v951_v31  ;;  %v1128_v39 = vpack.c.bf16 %v1114_v32, %v1113_v28  ;;  %vm1020_vm10 = vcmp.ne.f32.partialorder %v1842_v30, %v1842_v30  ;;  %v1099_v42 = vmul.f32 %v1083_v33, %v1067_v36 }
 0x25d   : > { %v956_v34 = vpop.f32.mrf.mxu1  ;;  %v1036_v40 = vsel %vm1020_vm10, 0.01, %v1842_v30  ;;  %v945_v31 = vadd.f32 %v2427_v13, %v2415_v53  ;;  %v949_v30 = vadd.f32 %v2433_v23, %v2415_v53  ;;  %v1090_v23 = vld [vmem:[%s2344_s13 + $0x58] sm:$0xff] }
 0x25e   : > { %1849 = vpow2.f32 %v1001_v37  ;;  %v957_v43 = vadd.f32 %v956_v34, %v2398_v22  ;;  %1639 = vmatmul.mubr.bf16.vlgmr.msra.gmra.mxu0 %v1128_v39  ;;  %vm1052_vm11 = vcmp.eq.f32.partialorder %v1036_v40, inf  ;;  %v1115_v57 = vadd.f32 %v1099_v42, %v925_v46 }
 0x25f   : > { %v1844_v45 = vpop.eup %1843  ;;  %v2445_v47 = vpop.f32.mrf.mxu1  ;;  %v1068_v49 = vsel %vm1052_vm11, 3.4028235e+38, %v1036_v40 }
 0x260   : > { %v1003_v51 = vmul.f32 1.442695, %v957_v43  ;;  %v1100_v55 = vmul.f32 %v1084_v41, %v1068_v49  ;;  %vm1021_vm12 = vcmp.ne.f32.partialorder %v1844_v45, %v1844_v45 }
 0x261   : > { %v960_v56 = vpop.f32.mrf.mxu1  ;;  %v1037_v58 = vsel %vm1021_vm12, 0.01, %v1844_v45  ;;  %v1089_v45 = vld [vmem:[%s2344_s13 + $0x50] sm:$0xff] }
 0x262   : > { %1851 = vpow2.f32 %v1003_v51  ;;  %v961_v59 = vadd.f32 %v960_v56, %v2398_v22  ;;  %v1116_v60 = vadd.f32 %v1100_v55, %v929_v50  ;;  %vm1053_vm13 = vcmp.eq.f32.partialorder %v1037_v58, inf }
 0x263   : > { %v1846_v38 = vpop.eup %1845  ;;  %v2451_v62 = vpop.f32.mrf.mxu1  ;;  %v1069_v63 = vsel %vm1053_vm13, 3.4028235e+38, %v1037_v58 }
 0x264   : > { %v1005_v1 = vmul.f32 1.442695, %v961_v59  ;;  %v1129_v2 = vpack.c.bf16 %v1116_v60, %v1115_v57  ;;  %vm1022_vm14 = vcmp.ne.f32.partialorder %v1846_v38, %v1846_v38  ;;  %v1101_v5 = vmul.f32 %v1085_v61, %v1069_v63 }
 0x265   : > { %v966_v44 = vpop.f32.mrf.mxu1  ;;  %v1038_v3 = vsel %vm1022_vm14, 0.01, %v1846_v38  ;;  %v959_v57 = vadd.f32 %v2445_v47, %v2415_v53 }
 0x266   : > { %1853 = vpow2.f32 %v1005_v1  ;;  %v967_v6 = vadd.f32 %v966_v44, %v2398_v22  ;;  %1642 = vmatprep.mubr.bf16.mxu0 %v1129_v2  ;;  %vm1054_vm15 = vcmp.eq.f32.partialorder %v1038_v3, inf  ;;  %v1117_v52 = vadd.f32 %v1101_v5, %v935_v8  ;;  %v1091_v1 = vld [vmem:[%s2344_s13 + $0x60] sm:$0xff] }
 0x267   : > { %v1848_v7 = vpop.eup %1847  ;;  %v2457_v9 = vpop.f32.mrf.mxu1  ;;  %v1070_v10 = vsel %vm1054_vm15, 3.4028235e+38, %v1038_v3  ;;  %v1092_v3 = vld [vmem:[%s2344_s13 + $0x68] sm:$0xff]  ;;  %v965_v5 = vadd.f32 %v2451_v62, %v2415_v53 }
 0x268   : > { %v1007_v12 = vmul.f32 1.442695, %v967_v6  ;;  %v1102_v14 = vmul.f32 %v1086_v4, %v1070_v10  ;;  %vm1023_vm0 = vcmp.ne.f32.partialorder %v1848_v7, %v1848_v7  ;;  %v969_v6 = vadd.f32 %v2457_v9, %v2415_v53 }
 0x269   : > { %v970_v48 = vpop.f32.mrf.mxu1  ;;  %v1039_v15 = vsel %vm1023_vm0, 0.01, %v1848_v7 }
 0x26a   : > { %1855 = vpow2.f32 %v1007_v12  ;;  %v971_v16 = vadd.f32 %v970_v48, %v2398_v22  ;;  %v1118_v17 = vadd.f32 %v1102_v14, %v939_v11  ;;  %vm1055_vm1 = vcmp.eq.f32.partialorder %v1039_v15, inf  ;;  %v1093_v48 = vld [vmem:[%s2344_s13 + $0x70] sm:$0xff] }
 0x26b   : > { %v1850_v54 = vpop.eup %1849  ;;  %v2463_v19 = vpop.f32.mrf.mxu1  ;;  %v1071_v20 = vsel %vm1055_vm1, 3.4028235e+38, %v1039_v15 }
 0x26c   : > { %v1009_v21 = vmul.f32 1.442695, %v971_v16  ;;  %v1130_v24 = vpack.c.bf16 %v1118_v17, %v1117_v52  ;;  %vm1024_vm2 = vcmp.ne.f32.partialorder %v1850_v54, %v1850_v54  ;;  %v1103_v27 = vmul.f32 %v1087_v18, %v1071_v20  ;;  %v1094_v16 = vld [vmem:[%s2344_s13 + $0x78] sm:$0xff] }
 0x26d   : > { %v976_v0 = vpop.f32.mrf.mxu1  ;;  %v1040_v25 = vsel %vm1024_vm2, 0.01, %v1850_v54  ;;  %v975_v9 = vadd.f32 %v2463_v19, %v2415_v53 }
 0x26e   : > { %1857 = vpow2.f32 %v1009_v21  ;;  %v977_v28 = vadd.f32 %v976_v0, %v2398_v22  ;;  %1643 = vmatmul.mubr.bf16.gmra.mxu0 %v1130_v24  ;;  %vm1056_vm3 = vcmp.eq.f32.partialorder %v1040_v25, inf  ;;  %v1119_v40 = vadd.f32 %v1103_v27, %v945_v31  ;;  %v1524_v0 = vld [vmem:[%s2572_s6] ss:$0 sm:$0xff] }
 0x26f   : > { %v1852_v29 = vpop.eup %1851  ;;  %v2469_v32 = vpop.f32.mrf.mxu1  ;;  %v1072_v33 = vsel %vm1056_vm3, 3.4028235e+38, %v1040_v25 }
 0x270   : > { %vm1025_vm4 = vcmp.ne.f32.partialorder %v1852_v29, %v1852_v29  ;;  %v1011_v36 = vmul.f32 1.442695, %v977_v28  ;;  %v1104_v37 = vmul.f32 %v1088_v26, %v1072_v33  ;;  %v979_v18 = vadd.f32 %v2469_v32, %v2415_v53 }
 0x271   : > { %v1041_v39 = vsel %vm1025_vm4, 0.01, %v1852_v29  ;;  %v980_v34 = vpop.f32.mrf.mxu1 }
 0x272   : > { %vm1057_vm5 = vcmp.eq.f32.partialorder %v1041_v39, inf  ;;  %1859 = vpow2.f32 %v1011_v36  ;;  %v981_v41 = vadd.f32 %v980_v34, %v2398_v22  ;;  %v1120_v42 = vadd.f32 %v1104_v37, %v949_v30 }
 0x273   : > { %v1854_v13 = vpop.eup %1853  ;;  %v1073_v43 = vsel %vm1057_vm5, 3.4028235e+38, %v1041_v39  ;;  %v955_v22 = vadd.f32 %v2439_v35, %v2415_v53 }
 0x274   : > { %vm1026_vm6 = vcmp.ne.f32.partialorder %v1854_v13, %v1854_v13  ;;  %v1013_v46 = vmul.f32 1.442695, %v981_v41  ;;  %v1131_v49 = vpack.c.bf16 %v1120_v42, %v1119_v40  ;;  %v1105_v51 = vmul.f32 %v1089_v45, %v1073_v43 }
 0x275   : > { %v1042_v50 = vsel %vm1026_vm6, 0.01, %v1854_v13 }
 0x276   : > { %vm1058_vm7 = vcmp.eq.f32.partialorder %v1042_v50, inf  ;;  %1861 = vpow2.f32 %v1013_v46  ;;  %1646 = vmatprep.mubr.bf16.mxu1 %v1131_v49  ;;  %v1121_v60 = vadd.f32 %v1105_v51, %v955_v22 }
 0x277   : > { %v1856_v55 = vpop.eup %1855  ;;  %v1074_v56 = vsel %vm1058_vm7, 3.4028235e+38, %v1042_v50 }
 0x278   : > { %v1106_v58 = vmul.f32 %v1090_v23, %v1074_v56  ;;  %vm1027_vm8 = vcmp.ne.f32.partialorder %v1856_v55, %v1856_v55 }
 0x279   : > { %v1043_v59 = vsel %vm1027_vm8, 0.01, %v1856_v55 }
 0x27a   : > { %v1122_v61 = vadd.f32 %v1106_v58, %v959_v57  ;;  %vm1059_vm9 = vcmp.eq.f32.partialorder %v1043_v59, inf }
 0x27b   : > { %v1858_v38 = vpop.eup %1857  ;;  %v1075_v63 = vsel %vm1059_vm9, 3.4028235e+38, %v1043_v59 }
 0x27c   : > { %v1132_v2 = vpack.c.bf16 %v1122_v61, %v1121_v60  ;;  %vm1028_vm10 = vcmp.ne.f32.partialorder %v1858_v38, %v1858_v38  ;;  %v1107_v35 = vmul.f32 %v1091_v1, %v1075_v63 }
 0x27d   : > { %v1044_v44 = vsel %vm1028_vm10, 0.01, %v1858_v38 }
 0x27e   : > { %1647 = vmatmul.mubr.bf16.vlgmr.msra.gmra.mxu1 %v1132_v2  ;;  %vm1060_vm11 = vcmp.eq.f32.partialorder %v1044_v44, inf  ;;  %v1123_v10 = vadd.f32 %v1107_v35, %v965_v5 }
 0x27f   : > { %v1860_v4 = vpop.eup %1859  ;;  %v1076_v47 = vsel %vm1060_vm11, 3.4028235e+38, %v1044_v44 }
 0x280   : > { %v1108_v7 = vmul.f32 %v1092_v3, %v1076_v47  ;;  %vm1029_vm12 = vcmp.ne.f32.partialorder %v1860_v4, %v1860_v4 }
 0x281   : > { %v1045_v8 = vsel %vm1029_vm12, 0.01, %v1860_v4 }
 0x282   : > { %v1124_v11 = vadd.f32 %v1108_v7, %v969_v6  ;;  %vm1061_vm13 = vcmp.eq.f32.partialorder %v1045_v8, inf }
 0x283   : > { %v1862_v12 = vpop.eup %1861  ;;  %v1077_v14 = vsel %vm1061_vm13, 3.4028235e+38, %v1045_v8 }
 0x284   : > { %v1133_v52 = vpack.c.bf16 %v1124_v11, %v1123_v10  ;;  %vm1030_vm14 = vcmp.ne.f32.partialorder %v1862_v12, %v1862_v12  ;;  %v1109_v62 = vmul.f32 %v1093_v48, %v1077_v14 }
 0x285   : > { %v1046_v15 = vsel %vm1030_vm14, 0.01, %v1862_v12 }
 0x286   : > { %1650 = vmatprep.mubr.bf16.mxu1 %v1133_v52  ;;  %vm1062_vm15 = vcmp.eq.f32.partialorder %v1046_v15, inf  ;;  %v1125_v20 = vadd.f32 %v1109_v62, %v975_v9 }
 0x287   : > { %v1078_v17 = vsel %vm1062_vm15, 3.4028235e+38, %v1046_v15 }
 0x288   : > { %v1110_v54 = vmul.f32 %v1094_v16, %v1078_v17 }
 0x28a   : > { %v1126_v21 = vadd.f32 %v1110_v54, %v979_v18 }
 0x28c   : > { %v1134_v24 = vpack.c.bf16 %v1126_v21, %v1125_v20 }
 0x28e   : > { %1651 = vmatmul.mubr.bf16.gmra.mxu1 %v1134_v24 }
 0x31e   : > { %v1640_v25 = vpop.f32.mrf.mxu0 }
 0x31f   : > { %v1249_v26 = vadd.f32 %v1640_v25, %v1524_v0 }
 0x320   : > { %v1240_v27 = vpop.f32.mrf.mxu0 }
 0x321   : > { %1305 = vst [vmem:[%s2496_s20 + $0x10] sm:$0xff] %v1249_v26  ;;  %v1241_v53 = vadd.f32 %v1524_v0, %v1240_v27 }
 0x322   : > { %v1641_v19 = vpop.f32.mrf.mxu0 }
 0x323   : > { %1303 = vst [vmem:[%s2496_s20] sm:$0xff] %v1241_v53  ;;  %v1252_v28 = vadd.f32 %v1641_v19, %v1524_v0 }
 0x324   : > { %v1243_v29 = vpop.f32.mrf.mxu0 }
 0x325   : > { %1306 = vst [vmem:[%s2496_s20 + $0x18] sm:$0xff] %v1252_v28  ;;  %v1244_v31 = vadd.f32 %v1524_v0, %v1243_v29 }
 0x327   : > { %1304 = vst [vmem:[%s2496_s20 + $0x8] sm:$0xff] %v1244_v31 }
 0x32e   : > { %v1644_v32 = vpop.f32.mrf.mxu0 }
 0x32f   : > { %v1265_v33 = vadd.f32 %v1644_v32, %v1524_v0 }
 0x330   : > { %v1256_v30 = vpop.f32.mrf.mxu0 }
 0x331   : > { %1309 = vst [vmem:[%s2496_s20 + $0x30] sm:$0xff] %v1265_v33  ;;  %v1257_v36 = vadd.f32 %v1524_v0, %v1256_v30 }
 0x332   : > { %v1645_v37 = vpop.f32.mrf.mxu0 }
 0x333   : > { %1307 = vst [vmem:[%s2496_s20 + $0x20] sm:$0xff] %v1257_v36  ;;  %v1268_v39 = vadd.f32 %v1645_v37, %v1524_v0 }
 0x334   : > { %v1259_v34 = vpop.f32.mrf.mxu0 }
 0x335   : > { %1310 = vst [vmem:[%s2496_s20 + $0x38] sm:$0xff] %v1268_v39  ;;  %v1260_v40 = vadd.f32 %v1524_v0, %v1259_v34 }
 0x337   : > { %1308 = vst [vmem:[%s2496_s20 + $0x28] sm:$0xff] %v1260_v40 }
 0x33e   : > { %v1648_v41 = vpop.f32.mrf.mxu1 }
 0x33f   : > { %v1281_v42 = vadd.f32 %v1648_v41, %v1524_v0 }
 0x340   : > { %v1272_v13 = vpop.f32.mrf.mxu1 }
 0x341   : > { %1313 = vst [vmem:[%s2496_s20 + $0x50] sm:$0xff] %v1281_v42  ;;  %v1273_v43 = vadd.f32 %v1524_v0, %v1272_v13 }
 0x342   : > { %v1649_v45 = vpop.f32.mrf.mxu1 }
 0x343   : > { %1311 = vst [vmem:[%s2496_s20 + $0x40] sm:$0xff] %v1273_v43  ;;  %v1284_v46 = vadd.f32 %v1649_v45, %v1524_v0 }
 0x344   : > { %v1275_v49 = vpop.f32.mrf.mxu1 }
 0x345   : > { %1314 = vst [vmem:[%s2496_s20 + $0x58] sm:$0xff] %v1284_v46  ;;  %v1276_v50 = vadd.f32 %v1524_v0, %v1275_v49 }
 0x347   : > { %1312 = vst [vmem:[%s2496_s20 + $0x48] sm:$0xff] %v1276_v50 }
 0x34e   : > { %v1652_v23 = vpop.f32.mrf.mxu1 }
 0x34f   : > { %v1297_v51 = vadd.f32 %v1652_v23, %v1524_v0 }
 0x350   : > { %v1288_v55 = vpop.f32.mrf.mxu1 }
 0x351   : > { %1317 = vst [vmem:[%s2496_s20 + $0x70] sm:$0xff] %v1297_v51  ;;  %v1289_v56 = vadd.f32 %v1524_v0, %v1288_v55 }
 0x352   : > { %v1653_v22 = vpop.f32.mrf.mxu1 }
 0x353   : > { %1315 = vst [vmem:[%s2496_s20 + $0x60] sm:$0xff] %v1289_v56  ;;  %v1300_v57 = vadd.f32 %v1653_v22, %v1524_v0 }
 0x354   : > { %v1291_v58 = vpop.f32.mrf.mxu1 }
 0x355   : > { %1318 = vst [vmem:[%s2496_s20 + $0x78] sm:$0xff] %v1300_v57  ;;  %v1292_v59 = vadd.f32 %v1524_v0, %v1291_v58 }
 0x357   : > { %1316 = vst [vmem:[%s2496_s20 + $0x68] sm:$0xff] %v1292_v59 }
 0x358   : > { %2010 = shalt.err (!%p2007_p0)
}
 0x359   : > { %s2011_s24 = scalar_lea.hbm %s2517_s1, 2048  ;;  %s2015_s22 = scalar_lea.hbm %s2574_s8, 4096 }
 0x35a   : > { %p2012_p10 = scmp.ne.s32.totalorder %s2517_s1, %s2011_s24  ;;  %p2016_p9 = scmp.lt.s32.totalorder %s2517_s1, %s2574_s8 }
 0x35b   : > { %p2017_p13 = scmp.lt.s32.totalorder %s2015_s22, %s2011_s24 }
 0x35c   : > { %p2013_p7 = pnand %p2012_p10, %p2610_p11 }
 0x35d   : > { %p2018_p3 = por %p2017_p13, %p2016_p9 }
 0x35e   : > { %p2014_p2 = pneg %p2013_p7 }
 0x360   : > { %p2019_p1 = pnand %p2018_p3, %p2014_p2 }
 0x362   : > { %2022 = shalt.err (!%p2019_p1)
}
 0x363   : > { %s2086_s18 = smov 128   ;;  %s2087_s16 = smov 8  }
 0x364   : > { %1686 = dma.vmem_to_hbm [thread:$0]  (%p2610_p11), %s2519_s27, 2048, %s2517_s1, %s2525_s9, %s2086_s18, %s2086_s18, %s2087_s16  }
 0x365 PF: > { %s2611_s20 = sld [smem:[#allocation17_spill]]  ;;  %p2614_p6 = scmp.ge.s32.totalorder %s2073_s30, 2 }
 0x366   : > { %s2612_s10 = sld [smem:[#allocation18_spill]] }
 0x36b   : > { %s1348_s21 = sand.u32 1, %s2611_s20  }
 0x36c   : > { %p2613_p4 = scmp.ne.s32.totalorder %s2612_s10, 0  ;;  %s1349_s17 = scalar_lea.sflag [#allocation4], %s1348_s21 }
 0x36e   : > { %p1706_p8 = pnand %p2614_p6, %p2613_p4 }
 0x370   : > { %p1707_p12 = pneg %p1706_p8 }
 0x372   : > { %2056 = dma.done.wait (%p1707_p12), %s1349_s17, 2048  }
 0x373   : > { %2058 = vsyncadd (%p1707_p12), %s1349_s17, 4294965248  ;;  %s2615_s30 = sld [smem:[#allocation19_spill]]  ;;  %s2617_s27 = smov %s2065_s28 }
 0x374   : > { %s2616_s25 = sld [smem:[#allocation20_spill]]  ;;  %s2618_s28 = smov %s2069_s29 }
 0x379   : > { %p23_p5 = scmp.ge.s32.totalorder %s2615_s30, 4  }
 0x37a   : > { %s2619_s29 = smov %s2616_s25 }
 0x37b   :  { %25 = sbr.rel (!%p23_p5) target bundleno = 9 (0x9), region = 120 }
 0x380   :  { %1354 = vsyncpa [#allocation3], 1 }
 0x381   :  { %1356 = vsyncpa [#allocation3 + $0x1], 1 }
 0x382   :  { %1357 = vsyncpa [#allocation6], 1 }
 0x383   :  { %1358 = vsyncpa [#allocation9], 1 }
 0x384   :  { %1359 = vsyncpa [#allocation4], 1 }
 0x385   :  { %1361 = vsyncpa [#allocation4 + $0x1], 1 }

</bundles_post_ra>
